<compile_context>
chip_gen: v7x
topology: tpu7x:2x2x1
jax: 0.10.0
libtpu: 0.0.40
codegen_flags: <defaults>
</compile_context>

<pallas_src>
import jax
import jax.numpy as jnp
from jax.experimental import pallas as pl
from jax.experimental.pallas import tpu as pltpu


def _gated_att_kernel(x_ref, w1_ref, w2_ref, m_ref, out_ref):
    x = x_ref[0]  # (C, HW) float32, lane-dense

    # ---- Channel attention: avg & max pool over spatial, fused shared MLP ----
    ch_avg = jnp.mean(x, axis=1, keepdims=True)  # (C, 1)
    ch_max = jnp.max(x, axis=1, keepdims=True)   # (C, 1)
    lane = jax.lax.broadcasted_iota(jnp.int32, (x.shape[0], 2), 1)
    pooled = jnp.where(lane == 0, ch_avg, ch_max)                      # (C, 2)
    h = jnp.maximum(
        jnp.dot(w1_ref[...], pooled, preferred_element_type=jnp.float32), 0.0)
    mlp = jnp.dot(w2_ref[...], h, preferred_element_type=jnp.float32)  # (C, 2)
    ca = jax.nn.sigmoid(mlp[:, 0:1] + mlp[:, 1:2])                     # (C, 1)
    cf = x * ca                                                        # (C, HW)

    # ---- Spatial attention: mean & max over channels, conv as one MXU matmul ----
    sp = jnp.concatenate(
        [jnp.mean(x, axis=0, keepdims=True),
         jnp.max(x, axis=0, keepdims=True)], axis=1)                   # (1, 2*HW)
    conv = jnp.dot(sp, m_ref[...], preferred_element_type=jnp.float32)  # (1, HW)
    sa = jax.nn.sigmoid(conv)
    sf = x * sa                                                        # (C, HW)

    # ---- Gated fusion: cf*a + sf*(1-a) == sf + a*(cf - sf) ----
    alpha = jax.nn.sigmoid(cf + sf)
    out_ref[0] = sf + alpha * (cf - sf)


def _spatial_conv_matrix(conv_w, H, W):
    """Fold the zero-padded KxK (2->1) conv into a (2*H*W, H*W) matmul operand.

    conv_flat = concat([mean_flat, max_flat], -1) @ M  reproduces
    conv2d(stack([mean, max]), conv_w, padding=K//2) exactly.
    """
    K = conv_w.shape[-1]
    pad = K // 2
    oh = jnp.arange(H)[:, None, None, None]
    ow = jnp.arange(W)[None, :, None, None]
    ih = jnp.arange(H)[None, None, :, None]
    iw = jnp.arange(W)[None, None, None, :]
    ky = ih - oh + pad
    kx = iw - ow + pad
    valid = (ky >= 0) & (ky < K) & (kx >= 0) & (kx < K)
    kyc = jnp.clip(ky, 0, K - 1)
    kxc = jnp.clip(kx, 0, K - 1)
    mats = []
    for ci in range(conv_w.shape[1]):
        m = jnp.where(valid, conv_w[0, ci][kyc, kxc], 0.0)  # (H, W, H, W): [out, in]
        mats.append(m.reshape(H * W, H * W).T)              # (in, out)
    return jnp.concatenate(mats, axis=0).astype(jnp.float32)  # (2*H*W, H*W)


def gated_att_pallas(x, w1, w2, conv_w):
    B, C, H, W = x.shape
    Ch = w1.shape[0]
    HW = H * W

    x_flat = x.reshape(B, C, HW).astype(jnp.float32)          # lane-dense layout
    m = _spatial_conv_matrix(conv_w.astype(jnp.float32), H, W)

    out_flat = pl.pallas_call(
        _gated_att_kernel,
        out_shape=jax.ShapeDtypeStruct((B, C, HW), jnp.float32),
        grid=(B,),
        in_specs=[
            pl.BlockSpec((1, C, HW), lambda b: (b, 0, 0)),
            pl.BlockSpec((Ch, C), lambda b: (0, 0)),
            pl.BlockSpec((C, Ch), lambda b: (0, 0)),
            pl.BlockSpec((2 * HW, HW), lambda b: (0, 0)),
        ],
        out_specs=pl.BlockSpec((1, C, HW), lambda b: (b, 0, 0)),
        compiler_params=pltpu.CompilerParams(dimension_semantics=("parallel",)),
    )(x_flat, w1.astype(jnp.float32), w2.astype(jnp.float32), m)
    return out_flat.reshape(B, C, H, W)


def gated_att_ref(x, w1, w2, conv_w):
    """Pure-JAX reference of the PyTorch forward (high precision)."""
    hp = jax.lax.Precision.HIGHEST
    ch_avg = x.mean(axis=(2, 3))  # (B, C)
    ch_max = x.max(axis=(2, 3))   # (B, C)

    def mlp(v):
        return jnp.dot(jnp.maximum(jnp.dot(v, w1.T, precision=hp), 0.0),
                       w2.T, precision=hp)

    ca = jax.nn.sigmoid(mlp(ch_avg) + mlp(ch_max))[:, :, None, None]
    cf = x * ca

    sp = jnp.concatenate(
        [x.mean(axis=1, keepdims=True), x.max(axis=1, keepdims=True)], axis=1)
    pad = conv_w.shape[-1] // 2
    conv = jax.lax.conv_general_dilated(
        sp, conv_w, window_strides=(1, 1), padding=((pad, pad), (pad, pad)),
        dimension_numbers=("NCHW", "OIHW", "NCHW"), precision=hp)
    sf = x * jax.nn.sigmoid(conv)

    alpha = jax.nn.sigmoid(cf + sf)
    return cf * alpha + sf * (1.0 - alpha)


if __name__ == "__main__":
    B, C, H, W, ratio, K = 2, 16, 16, 16, 8, 7
    Ch = C // ratio

    key = jax.random.PRNGKey(0)
    kx, k1, k2, k3 = jax.random.split(key, 4)
    x = jax.random.normal(kx, (B, C, H, W), jnp.float32)
    # PyTorch parameter shapes: Conv2d(C, C//r, 1), Conv2d(C//r, C, 1),
    # Conv2d(2, 1, K, padding=K//2), all bias-free.
    w1 = jax.random.normal(k1, (Ch, C), jnp.float32) * 0.2
    w2 = jax.random.normal(k2, (C, Ch), jnp.float32) * 0.2
    conv_w = jax.random.normal(k3, (1, 2, K, K), jnp.float32) * 0.1

    out = jax.block_until_ready(gated_att_pallas(x, w1, w2, conv_w))

    ref = gated_att_ref(x, w1, w2, conv_w)
    assert out.shape == x.shape and out.dtype == x.dtype
    max_err = float(jnp.max(jnp.abs(out - ref)))
    assert jnp.allclose(out, ref, rtol=2e-3, atol=2e-3), max_err
    print("KERNEL_OK")
</pallas_src>

<mosaic_0001>
module attributes {stable_mosaic.version = 11 : i64} {
  func.func @_gated_att_kernel(%arg0: i32, %arg1: memref<1x16x256xf32, #tpu.memory_space<vmem>>, %arg2: memref<2x16xf32, #tpu.memory_space<vmem>>, %arg3: memref<16x2xf32, #tpu.memory_space<vmem>>, %arg4: memref<512x256xf32, #tpu.memory_space<vmem>>, %arg5: memref<1x16x256xf32, #tpu.memory_space<vmem>>) attributes {dimension_semantics = [#tpu.dimension_semantics<parallel>], iteration_bounds = array<i64: 2>, scalar_prefetch = 0 : i64, scratch_operands = 0 : i64, tpu.core_type = #tpu.core_type<tc>, window_params = [{transform_indices = @transform_0, window_bounds = array<i64: 1, 16, 256>}, {pipeline_mode = #tpu.pipeline_mode<synchronous>, transform_indices = @transform_1, window_bounds = array<i64: 2, 16>}, {pipeline_mode = #tpu.pipeline_mode<synchronous>, transform_indices = @transform_2, window_bounds = array<i64: 16, 2>}, {pipeline_mode = #tpu.pipeline_mode<synchronous>, transform_indices = @transform_3, window_bounds = array<i64: 512, 256>}, {transform_indices = @transform_4, window_bounds = array<i64: 1, 16, 256>}]} {
    %c0 = arith.constant 0 : index
    %c0_0 = arith.constant 0 : index
    %c0_1 = arith.constant 0 : index
    %0 = vector.load %arg1[%c0, %c0_0, %c0_1] : memref<1x16x256xf32, #tpu.memory_space<vmem>>, vector<1x16x256xf32>
    %1 = vector.shape_cast %0 : vector<1x16x256xf32> to vector<16x256xf32>
    %cst = arith.constant dense<0.000000e+00> : vector<16xf32>
    %2 = vector.multi_reduction <add>, %1, %cst [1] : vector<16x256xf32> to vector<16xf32>
    %3 = vector.shape_cast %2 : vector<16xf32> to vector<16x1xf32>
    %cst_2 = arith.constant 2.560000e+02 : f32
    %4 = vector.broadcast %cst_2 : f32 to vector<16x1xf32>
    %5 = arith.divf %3, %4 : vector<16x1xf32>
    %cst_3 = arith.constant dense<0xFF800000> : vector<16xf32>
    %6 = vector.multi_reduction <maximumf>, %1, %cst_3 [1] : vector<16x256xf32> to vector<16xf32>
    %7 = vector.shape_cast %6 : vector<16xf32> to vector<16x1xf32>
    %8 = tpu.iota {dimensions = array<i32: 1>} : vector<16x2xi32>
    %c0_i32 = arith.constant 0 : i32
    %9 = vector.broadcast %c0_i32 : i32 to vector<16x2xi32>
    %10 = arith.cmpi eq, %8, %9 : vector<16x2xi32>
    %11 = vector.shape_cast %5 : vector<16x1xf32> to vector<16x1xf32>
    %12 = vector.broadcast %11 : vector<16x1xf32> to vector<16x2xf32>
    %13 = vector.shape_cast %7 : vector<16x1xf32> to vector<16x1xf32>
    %14 = vector.broadcast %13 : vector<16x1xf32> to vector<16x2xf32>
    %15 = arith.select %10, %12, %14 : vector<16x2xi1>, vector<16x2xf32>
    %c0_4 = arith.constant 0 : index
    %c0_5 = arith.constant 0 : index
    %16 = vector.load %arg2[%c0_4, %c0_5] : memref<2x16xf32, #tpu.memory_space<vmem>>, vector<2x16xf32>
    %cst_6 = arith.constant dense<0.000000e+00> : vector<2x2xf32>
    %17 = tpu.matmul %16, %15, %cst_6 {dimension_numbers = #tpu.dot_dimension_numbers<[1], [0], [0], [1], [0, 0, 1, 1], [], []>} : vector<2x16xf32>, vector<16x2xf32>, vector<2x2xf32> -> vector<2x2xf32>
    %cst_7 = arith.constant 0.000000e+00 : f32
    %18 = vector.broadcast %cst_7 : f32 to vector<2x2xf32>
    %19 = arith.maximumf %17, %18 : vector<2x2xf32>
    %c0_8 = arith.constant 0 : index
    %c0_9 = arith.constant 0 : index
    %20 = vector.load %arg3[%c0_8, %c0_9] : memref<16x2xf32, #tpu.memory_space<vmem>>, vector<16x2xf32>
    %cst_10 = arith.constant dense<0.000000e+00> : vector<16x2xf32>
    %21 = tpu.matmul %20, %19, %cst_10 {dimension_numbers = #tpu.dot_dimension_numbers<[1], [0], [0], [1], [0, 0, 1, 1], [], []>} : vector<16x2xf32>, vector<2x2xf32>, vector<16x2xf32> -> vector<16x2xf32>
    %22 = vector.extract_strided_slice %21 {offsets = [0, 0], sizes = [16, 1], strides = [1, 1]} : vector<16x2xf32> to vector<16x1xf32>
    %23 = vector.extract_strided_slice %21 {offsets = [0, 1], sizes = [16, 1], strides = [1, 1]} : vector<16x2xf32> to vector<16x1xf32>
    %24 = arith.addf %22, %23 : vector<16x1xf32>
    %25 = arith.negf %24 : vector<16x1xf32>
    %26 = math.exp %25 : vector<16x1xf32>
    %cst_11 = arith.constant 1.000000e+00 : f32
    %27 = vector.broadcast %cst_11 : f32 to vector<16x1xf32>
    %28 = arith.addf %27, %26 : vector<16x1xf32>
    %29 = arith.divf %27, %28 : vector<16x1xf32>
    %30 = vector.broadcast %29 : vector<16x1xf32> to vector<16x256xf32>
    %31 = arith.mulf %1, %30 : vector<16x256xf32>
    %cst_12 = arith.constant dense<0.000000e+00> : vector<256xf32>
    %32 = vector.multi_reduction <add>, %1, %cst_12 [0] : vector<16x256xf32> to vector<256xf32>
    %33 = vector.shape_cast %32 : vector<256xf32> to vector<1x256xf32>
    %cst_13 = arith.constant 1.600000e+01 : f32
    %34 = vector.broadcast %cst_13 : f32 to vector<1x256xf32>
    %35 = arith.divf %33, %34 : vector<1x256xf32>
    %cst_14 = arith.constant dense<0xFF800000> : vector<256xf32>
    %36 = vector.multi_reduction <maximumf>, %1, %cst_14 [0] : vector<16x256xf32> to vector<256xf32>
    %37 = vector.shape_cast %36 : vector<256xf32> to vector<1x256xf32>
    %38 = tpu.concatenate %35, %37 in 1 : vector<1x256xf32>, vector<1x256xf32> -> vector<1x512xf32>
    %c0_15 = arith.constant 0 : index
    %c0_16 = arith.constant 0 : index
    %39 = vector.load %arg4[%c0_15, %c0_16] : memref<512x256xf32, #tpu.memory_space<vmem>>, vector<512x256xf32>
    %cst_17 = arith.constant dense<0.000000e+00> : vector<1x256xf32>
    %40 = tpu.matmul %38, %39, %cst_17 {dimension_numbers = #tpu.dot_dimension_numbers<[1], [0], [0], [1], [0, 0, 1, 1], [], []>} : vector<1x512xf32>, vector<512x256xf32>, vector<1x256xf32> -> vector<1x256xf32>
    %41 = arith.negf %40 : vector<1x256xf32>
    %42 = math.exp %41 : vector<1x256xf32>
    %cst_18 = arith.constant 1.000000e+00 : f32
    %43 = vector.broadcast %cst_18 : f32 to vector<1x256xf32>
    %44 = arith.addf %43, %42 : vector<1x256xf32>
    %45 = arith.divf %43, %44 : vector<1x256xf32>
    %46 = vector.broadcast %45 : vector<1x256xf32> to vector<16x256xf32>
    %47 = arith.mulf %1, %46 : vector<16x256xf32>
    %48 = arith.addf %31, %47 : vector<16x256xf32>
    %49 = arith.negf %48 : vector<16x256xf32>
    %50 = math.exp %49 : vector<16x256xf32>
    %cst_19 = arith.constant 1.000000e+00 : f32
    %51 = vector.broadcast %cst_19 : f32 to vector<16x256xf32>
    %52 = arith.addf %51, %50 : vector<16x256xf32>
    %53 = arith.divf %51, %52 : vector<16x256xf32>
    %54 = arith.subf %31, %47 : vector<16x256xf32>
    %55 = arith.mulf %53, %54 : vector<16x256xf32>
    %56 = arith.addf %47, %55 : vector<16x256xf32>
    %c0_20 = arith.constant 0 : index
    %c0_21 = arith.constant 0 : index
    %c0_22 = arith.constant 0 : index
    %57 = vector.load %arg5[%c0_20, %c0_21, %c0_22] : memref<1x16x256xf32, #tpu.memory_space<vmem>>, vector<1x16x256xf32>
    %58 = vector.shape_cast %57 : vector<1x16x256xf32> to vector<16x256xf32>
    %59 = vector.shape_cast %56 : vector<16x256xf32> to vector<1x16x256xf32>
    tpu.vector_store %arg5[%c0_20, %c0_21, %c0_22], %59 {strides = array<i32>} : memref<1x16x256xf32, #tpu.memory_space<vmem>>, vector<1x16x256xf32>,
    return
  }
  func.func @transform_0(%arg0: i32) -> (i32, i32, i32) {
    %c0_i32 = arith.constant 0 : i32
    %c0_i32_0 = arith.constant 0 : i32
    %c0_i32_1 = arith.constant 0 : i32
    return %arg0, %c0_i32, %c0_i32_0 : i32, i32, i32
  }
  func.func @transform_1(%arg0: i32) -> (i32, i32) {
    %c0_i32 = arith.constant 0 : i32
    %c0_i32_0 = arith.constant 0 : i32
    %c0_i32_1 = arith.constant 0 : i32
    return %c0_i32, %c0_i32_0 : i32, i32
  }
  func.func @transform_2(%arg0: i32) -> (i32, i32) {
    %c0_i32 = arith.constant 0 : i32
    %c0_i32_0 = arith.constant 0 : i32
    %c0_i32_1 = arith.constant 0 : i32
    return %c0_i32, %c0_i32_0 : i32, i32
  }
  func.func @transform_3(%arg0: i32) -> (i32, i32) {
    %c0_i32 = arith.constant 0 : i32
    %c0_i32_0 = arith.constant 0 : i32
    %c0_i32_1 = arith.constant 0 : i32
    return %c0_i32, %c0_i32_0 : i32, i32
  }
  func.func @transform_4(%arg0: i32) -> (i32, i32, i32) {
    %c0_i32 = arith.constant 0 : i32
    %c0_i32_0 = arith.constant 0 : i32
    %c0_i32_1 = arith.constant 0 : i32
    return %arg0, %c0_i32, %c0_i32_0 : i32, i32, i32
  }
}

</mosaic_0001>

<bundles_post_ra>
// kernel: tpu_custom_call.1
= control target key start
LH: loop header
LB: loop body
LE: loop exit
PB: predicated region body
PF: predicated region fallthrough
CT: control target
= control target key end

     0   :  { %9 = vsyncpa [#allocation3], 0  ;;  %s1625_s0 = inlined_call_operand.hbm [shape: f32[2,16,256], index: 0, kind: input, shape index: {}]   ;;  %s1626_s1 = inlined_call_operand.vmem [shape: f32[2,16], index: 1, kind: input, shape index: {}]   ;;  %s1627_s2 = inlined_call_operand.vmem [shape: f32[16,2], index: 2, kind: input, shape index: {}]   ;;  %s1628_s3 = inlined_call_operand.hbm [shape: f32[512,256], index: 3, kind: input, shape index: {}]   ;;  %s1629_s4 = inlined_call_operand.hbm [shape: f32[2,16,256], index: 4, kind: output, shape index: {}]  }
   0x1   :  { %11 = vsyncpa [#allocation3 + $0x1], 0 }
   0x2   :  { %12 = vsyncpa [#allocation6], 0 }
   0x3   :  { %13 = vsyncpa [#allocation4], 0 }
   0x4   :  { %15 = vsyncpa [#allocation4 + $0x1], 0  ;;  %s1369_s15 = smov 0   ;;  %s1371_s16 = smov 0  }
   0x5   :  { %s1373_s17 = smov 0   ;;  %s1375_s18 = smov 0  }
   0x6 LB: > { %s1390_s19 = sadd.s32 4294967295, %s1330_s18   ;;  %s921_s20 = sadd.s32 4294967294, %s1330_s18   ;;  %s1330_s18 = sphi %s1375_s18, %s1649_s18   ;;  %s1326_s17 = sphi %s1373_s17, %s1648_s17   ;;  %s1322_s16 = sphi %s1371_s16, %s1647_s16   ;;  %s1318_s15 = sphi %s1369_s15, %s1646_s15  }
   0x7   : > { %p41_p0 = scmp.ne.s32.totalorder %s1322_s16, %s1318_s15  ;;  %p1630_p1 = scmp.eq.s32.totalorder %s1390_s19, 0 }
   0x8   : > { %p134_p3 = scmp.eq.s32.totalorder %s921_s20, 1  ;;  %p922_p5 = scmp.ge.s32.totalorder %s1330_s18, 1 }
   0x9   : > { %p1399_p4 = por %p1630_p1, %p41_p0  ;;  %p141_p7 = scmp.lt.s32.totalorder %s1330_s18, 3 }
   0xa   : > { %p1404_p6 = por %p134_p3, %p41_p0  ;;  %s1332_s24 = smov [#allocation5]  }
   0xb   : > { %s1633_s21 = scalar_select %p1399_p4, 1, 0 }
   0xc   : > { %s1634_s22 = scalar_select %p1404_p6, 1, 0 }
   0xd   : > { %p1409_p8 = pnand %p922_p5, %p141_p7  ;;  %s159_s25 = sshll.u32 %s1332_s24, 4  ;;  %s1413_s25 = int_to_ptr.vmem [resolvable:$true] %s159_s25 }
   0xe   : > { %s1425_s27 = sadd.s32 1, %s1330_s18   ;;  %s28_s28 = sadd.s32 1, %s1326_s17 }
   0xf   : > { %s1635_s23 = scalar_select %p1409_p8, 1, 0 }
  0x10   : > { %p1110_p9 = pneg %p1409_p8  ;;  %s25_s29 = ssub.s32 %s1330_s18, %s1425_s27 }
  0x11   : > { %s1202_s6 = scalar_lea.hbm %s1628_s3, 16384 }
  0x12   : > { %p1420_p11 = pnand %p1110_p9, %p1630_p1  ;;  %p1203_p12 = scmp.ne.s32.totalorder %s1628_s3, %s1202_s6 }
  0x13   : > { %p1209_p5 = scmp.lt.u32.totalorder %s1202_s6, %s1628_s3 }
  0x14   : > { %p1204_p13 = pneg %p1420_p11 }
  0x16   : > { %p1205_p0 = pnand %p1204_p13, %p1203_p12 }
  0x18   : > { %p1206_p3 = pneg %p1205_p0 }
  0x1a   : > { %p1211_p7 = pnand %p1209_p5, %p1206_p3 }
  0x1c   : > { %1214 = shalt.err (!%p1211_p7)
}
  0x1d   : > { %s1215_s11 = scalar_lea.vmem %s1413_s25, 16384  ;;  %p1223_p2 = scmp.lt.s32.totalorder %s1413_s25, %s1413_s25 }
  0x1e   : > { %p1216_p9 = scmp.ne.s32.totalorder %s1413_s25, %s1215_s11  ;;  %p1224_p6 = scmp.lt.s32.totalorder %s1215_s11, %s1215_s11 }
  0x20   : > { %p1218_p10 = pnand %p1216_p9, %p1204_p13  ;;  %p1225_p4 = por %p1224_p6, %p1223_p2 }
  0x22   : > { %p1219_p1 = pneg %p1218_p10 }
  0x24   : > { %p1226_p8 = pnand %p1225_p4, %p1219_p1 }
  0x26   : > { %1229 = shalt.err (!%p1226_p8)
}
  0x27   : > { %s1333_s12 = smov 256   ;;  %s1334_s13 = smov 16  }
  0x28   : > { %1113 = dma.hbm_to_vmem [thread:$0]  (!%p1420_p11), %s1628_s3, 16384, %s1413_s25, [#allocation6], %s1333_s12, %s1333_s12, %s1334_s13  }
  0x29   : > { %p26_p1 = scmp.eq.s32.totalorder %s25_s29, 0  ;;  %p35_p2 = scmp.ne.s32.totalorder %s1326_s17, %s1322_s16 }
  0x2a   : > { %p36_p4 = scmp.eq.s32.totalorder %s1330_s18, 0  ;;  %p1123_p6 = scmp.lt.s32.totalorder %s1330_s18, 2 }
  0x2b   : > { %s1459_s24 = scalar_select %p26_p1, %s1326_s17, %s28_s28  }
  0x2c   : > { %p37_p8 = por %p36_p4, %p35_p2  ;;  %p1637_p10 = scmp.eq.s32.totalorder %s1390_s19, 1 }
  0x2d   : > { %s173_s26 = sand.u32 1, %s1326_s17   ;;  %s949_s5 = sshll.u32 %s1330_s18, 9 }
  0x2e   : > { %p1463_p12 = por %p1637_p10, %p35_p2  ;;  %s925_s6 = sshll.u32 %s173_s26, 5 }
  0x2f   : > { %s1472_s9 = scalar_lea.hbm %s1625_s0, %s949_s5  ;;  %s177_s25 = scalar_lea.vmem [#allocation2], %s925_s6 }
  0x30   : > { %s184_s28 = sshll.u32 %s177_s25, 4  ;;  %p1474_p11 = pnand %p1123_p6, %p37_p8  ;;  %s1478_s28 = int_to_ptr.vmem [resolvable:$true] %s184_s28 }
  0x31   : > { %s1480_s10 = scalar_lea.sflag [#allocation3], %s173_s26  ;;  %s1230_s11 = scalar_lea.hbm %s1472_s9, 512 }
  0x32   : > { %p1231_p13 = scmp.ne.s32.totalorder %s1472_s9, %s1230_s11  ;;  %p1232_p0 = pneg %p1474_p11 }
  0x33   : > { %s1235_s5 = scalar_lea.hbm %s1625_s0, 1024  ;;  %p1236_p7 = scmp.lt.u32.totalorder %s1472_s9, %s1625_s0 }
  0x34   : > { %p1233_p3 = pnand %p1232_p0, %p1231_p13  ;;  %p1237_p9 = scmp.lt.u32.totalorder %s1235_s5, %s1230_s11 }
  0x35   : > { %p1239_p2 = scmp.lt.u32.totalorder %s1230_s11, %s1472_s9 }
  0x36   : > { %p1234_p5 = pneg %p1233_p3  ;;  %p1238_p1 = por %p1237_p9, %p1236_p7 }
  0x38   : > { %p1240_p4 = por %p1239_p2, %p1238_p1 }
  0x3a   : > { %p1241_p6 = pnand %p1240_p4, %p1234_p5 }
  0x3c   : > { %1244 = shalt.err (!%p1241_p6)
}
  0x3d   : > { %s1245_s26 = scalar_lea.vmem %s1478_s28, 512  ;;  %s1335_s8 = smov [#allocation2]  }
  0x3e   : > { %p1246_p8 = scmp.ne.s32.totalorder %s1478_s28, %s1245_s26  ;;  %s1250_s25 = sshll.u32 %s1335_s8, 4  ;;  %s1251_s25 = int_to_ptr.vmem [resolvable:$false] %s1250_s25 }
  0x3f   : > { %s1252_s14 = scalar_lea.vmem %s1251_s25, 1024  ;;  %p1253_p3 = scmp.lt.s32.totalorder %s1478_s28, %s1251_s25 }
  0x40   : > { %p1248_p10 = pnand %p1246_p8, %p1232_p0  ;;  %p1254_p7 = scmp.lt.s32.totalorder %s1252_s14, %s1245_s26 }
  0x42   : > { %p1249_p13 = pneg %p1248_p10  ;;  %p1255_p9 = por %p1254_p7, %p1253_p3 }
  0x44   : > { %p1256_p1 = pnand %p1255_p9, %p1249_p13 }
  0x46   : > { %1259 = shalt.err (!%p1256_p1)
}
  0x47   : > { %1117 = dma.hbm_to_vmem [thread:$0]  (!%p1474_p11), %s1472_s9, 512, %s1478_s28, %s1480_s10, %s1333_s12, %s1333_s12, %s1334_s13  }
  0x48   : > { %p1640_p0 = scmp.ne.s32.totalorder %s1635_s23, 0 }
  0x49   : > { %s1514_s11 = sand.u32 (!%p1640_p0), 1, %s1322_s16   ;;  %p1641_p5 = scmp.ne.s32.totalorder (!%p1640_p0), %s1633_s21, 0 }
  0x4a   : > { %196 = sbr.rel (%p1640_p0) target bundleno = 996 (0x3e4), region = 36  ;;  %s929_s20 = sshll.u32 (!%p1640_p0), %s1514_s11, 5 }
  0x4b   : > { %s199_s5 = scalar_lea.sflag (!%p1640_p0), [#allocation3], %s1514_s11  ;;  %s202_s29 = scalar_lea.vmem (!%p1640_p0), [#allocation2], %s929_s20 }
  0x51   : > { %1305 = dma.done.wait (%p1641_p5), %s199_s5, 512  }
  0x52   : > { %1307 = vsyncadd (%p1641_p5), %s199_s5, 4294966784  ;;  %p1642_p11 = scmp.eq.s32.totalorder %s1390_s19, 0 }
  0x54   : > { %1309 = dma.done.wait (%p1642_p11), [#allocation6], 16384   ;;  %p1643_p2 = pmov %p1642_p11 }
  0x55   : > { %v1528_v0 = vld [vmem:[%s202_s29] sm:$0xff]  ;;  %v1530_v1 = vld [vmem:[%s202_s29 + $0x8] sm:$0xff]  ;;  %v1532_v2 = vld [vmem:[%s202_s29 + $0x10] sm:$0xff]  ;;  %v1336_v8 = vmov 0.0|0.0   ;;  %vm1337_vm0 = vmmov 0   ;;  %v1338_v9 = vmov 0.0   ;;  %v250_v10 = vlaneseq }
  0x56   : > { %1311 = vsyncadd (%p1643_p2), [#allocation6], 4294950912  ;;  %v235_v3 = vadd.f32 %v1530_v1, %v1528_v0  ;;  %v244_v4 = vmax.f32 %v1528_v0, %v1530_v1  ;;  %v1538_v5 = vld [vmem:[%s202_s29 + $0x18] sm:$0xff]  ;;  %969 = vmatprep.subr.bf16.mxu0 %v1336_v8  ;;  %961 = vmatprep.mubr.msk.f32.mxu0 %vm1337_vm0, %v1338_v9  ;;  %v255_v21 = vld [vmem:[%s1626_s1] sm:$0x3]  ;;  %vm256_vm2 = vcmask 130048  }
  0x57   : > { %v238_v6 = vadd.f32 %v1538_v5, %v1532_v2  ;;  %v247_v7 = vmax.f32 %v1532_v2, %v1538_v5  ;;  %v251_v12 = vand.u32 127, %v250_v10  ;;  %v331_v22 = vld [vmem:[%s1627_s2] sm:$0xff]  ;;  %vm333_vm3 = vcmask 15360   ;;  %v487_v23 = vld [vmem:[#allocation5 + $0x8] sm:$0xff]  ;;  %v489_v24 = vld [vmem:[#allocation5 + $0x18] sm:$0xff]  ;;  %s1339_s10 = smov 127  }
  0x58   : > { %236 = vadd.xlane.f32.xlu0 %v235_v3  ;;  %245 = vmax.xlane.f32.xlu1 %v244_v4  ;;  %v972_v25 = vpack.c.bf16 %v489_v24, %v487_v23  ;;  %v486_v26 = vld [vmem:[#allocation5] sm:$0xff]  ;;  %v488_v27 = vld [vmem:[#allocation5 + $0x10] sm:$0xff]  ;;  %v491_v29 = vld [vmem:[#allocation5 + $0x28] sm:$0xff]  ;;  %vm340_vm4 = vcmask 1041408   ;;  %s950_s6 = sshll.u32 %s1390_s19, 9  ;;  %s230_s7 = scalar_lea.vmem [#allocation7], %s929_s20 }
  0x59   : > { %vm252_vm1 = vcmp.eq.s32.totalorder %v251_v12, 0  ;;  %966 = vmatprep.mubr.msk.f32.mxu1 %vm333_vm3, %v331_v22  ;;  %v974_v28 = vpack.c.bf16 %v488_v27, %v486_v26  ;;  %v493_v30 = vld [vmem:[#allocation5 + $0x38] sm:$0xff]  ;;  %v490_v32 = vld [vmem:[#allocation5 + $0x20] sm:$0xff]  ;;  %v492_v33 = vld [vmem:[#allocation5 + $0x30] sm:$0xff]  ;;  %s838_s26 = sshll.u32 %s230_s7, 4  ;;  %s1579_s14 = scalar_lea.hbm %s1629_s4, %s950_s6  ;;  %s1581_s26 = int_to_ptr.vmem [resolvable:$true] %s838_s26 }
  0x5a   : > { %v976_v31 = vpack.c.bf16 %v493_v30, %v491_v29  ;;  %v978_v34 = vpack.c.bf16 %v492_v33, %v490_v32  ;;  %v495_v35 = vld [vmem:[#allocation5 + $0x48] sm:$0xff]  ;;  %v497_v36 = vld [vmem:[#allocation5 + $0x58] sm:$0xff]  ;;  %v494_v38 = vld [vmem:[#allocation5 + $0x40] sm:$0xff]  ;;  %s825_s19 = scalar_lea.sflag [#allocation4], %s1514_s11  ;;  %s1260_s20 = scalar_lea.vmem %s1581_s26, 512 }
  0x5b   : > { %v980_v37 = vpack.c.bf16 %v497_v36, %v495_v35  ;;  %v496_v39 = vld [vmem:[#allocation5 + $0x50] sm:$0xff]  ;;  %v499_v41 = vld [vmem:[#allocation5 + $0x68] sm:$0xff]  ;;  %v501_v42 = vld [vmem:[#allocation5 + $0x78] sm:$0xff]  ;;  %p1261_p4 = scmp.ne.s32.totalorder %s1581_s26, %s1260_s20  ;;  %s1341_s5 = smov [#allocation7]  }
  0x5c   : > { %239 = vadd.xlane.f32.xlu0 %v238_v6  ;;  %248 = vmax.xlane.f32.xlu1 %v247_v7  ;;  %v982_v40 = vpack.c.bf16 %v496_v39, %v494_v38  ;;  %v984_v43 = vpack.c.bf16 %v501_v42, %v499_v41  ;;  %v498_v44 = vld [vmem:[#allocation5 + $0x60] sm:$0xff]  ;;  %v500_v45 = vld [vmem:[#allocation5 + $0x70] sm:$0xff]  ;;  %v503_v47 = vld [vmem:[#allocation5 + $0x88] sm:$0xff]  ;;  %s1264_s29 = sshll.u32 %s1341_s5, 4  ;;  %s1265_s29 = int_to_ptr.vmem [resolvable:$false] %s1264_s29 }
  0x5d   : > { %v986_v46 = vpack.c.bf16 %v500_v45, %v498_v44  ;;  %v505_v48 = vld [vmem:[#allocation5 + $0x98] sm:$0xff]  ;;  %v502_v50 = vld [vmem:[#allocation5 + $0x80] sm:$0xff]  ;;  %v504_v51 = vld [vmem:[#allocation5 + $0x90] sm:$0xff]  ;;  %p1262_p6 = pnand %p1261_p4, %p1463_p12  ;;  %s1266_s21 = scalar_lea.vmem %s1265_s29, 1024 }
  0x5e   : > { %v988_v49 = vpack.c.bf16 %v505_v48, %v503_v47  ;;  %v990_v52 = vpack.c.bf16 %v504_v51, %v502_v50  ;;  %v507_v53 = vld [vmem:[#allocation5 + $0xa8] sm:$0xff]  ;;  %v509_v54 = vld [vmem:[#allocation5 + $0xb8] sm:$0xff]  ;;  %v506_v56 = vld [vmem:[#allocation5 + $0xa0] sm:$0xff]  ;;  %p1267_p10 = scmp.lt.s32.totalorder %s1581_s26, %s1265_s29  ;;  %p1268_p13 = scmp.lt.s32.totalorder %s1266_s21, %s1260_s20 }
  0x5f   : > { %v992_v55 = vpack.c.bf16 %v509_v54, %v507_v53  ;;  %v508_v57 = vld [vmem:[#allocation5 + $0xb0] sm:$0xff]  ;;  %v511_v59 = vld [vmem:[#allocation5 + $0xc8] sm:$0xff]  ;;  %v513_v60 = vld [vmem:[#allocation5 + $0xd8] sm:$0xff]  ;;  %p1263_p8 = pneg %p1262_p6 }
  0x60   : > { %v994_v58 = vpack.c.bf16 %v508_v57, %v506_v56  ;;  %v996_v61 = vpack.c.bf16 %v513_v60, %v511_v59  ;;  %v510_v62 = vld [vmem:[#allocation5 + $0xc0] sm:$0xff]  ;;  %v512_v63 = vld [vmem:[#allocation5 + $0xd0] sm:$0xff]  ;;  %v515_v4 = vld [vmem:[#allocation5 + $0xe8] sm:$0xff]  ;;  %p1269_p3 = por %p1268_p13, %p1267_p10 }
  0x61   : > { %v998_v3 = vpack.c.bf16 %v512_v63, %v510_v62  ;;  %v517_v6 = vld [vmem:[#allocation5 + $0xf8] sm:$0xff]  ;;  %v514_v8 = vld [vmem:[#allocation5 + $0xe0] sm:$0xff]  ;;  %v516_v9 = vld [vmem:[#allocation5 + $0xf0] sm:$0xff] }
  0x62   : > { %v1000_v7 = vpack.c.bf16 %v517_v6, %v515_v4  ;;  %v519_v12 = vld [vmem:[#allocation5 + $0x108] sm:$0xff]  ;;  %v557_v24 = vld [vmem:[#allocation5 + $0x238] sm:$0xff]  ;;  %v556_v32 = vld [vmem:[#allocation5 + $0x230] sm:$0xff]  ;;  %p1270_p7 = pnand %p1269_p3, %p1263_p8 }
  0x63   : > { %v555_v23 = vld [vmem:[#allocation5 + $0x228] sm:$0xff]  ;;  %v560_v38 = vld [vmem:[#allocation5 + $0x250] sm:$0xff] }
  0x64   : > { %v1040_v30 = vpack.c.bf16 %v557_v24, %v555_v23  ;;  %v559_v33 = vld [vmem:[#allocation5 + $0x248] sm:$0xff]  ;;  %v564_v44 = vld [vmem:[#allocation5 + $0x270] sm:$0xff] }
  0x65   : > { %v563_v39 = vld [vmem:[#allocation5 + $0x268] sm:$0xff]  ;;  %v568_v50 = vld [vmem:[#allocation5 + $0x290] sm:$0xff] }
  0x66   : > { %v567_v45 = vld [vmem:[#allocation5 + $0x288] sm:$0xff]  ;;  %v572_v56 = vld [vmem:[#allocation5 + $0x2b0] sm:$0xff] }
  0x67   : > { %v571_v51 = vld [vmem:[#allocation5 + $0x2a8] sm:$0xff]  ;;  %v576_v62 = vld [vmem:[#allocation5 + $0x2d0] sm:$0xff] }
  0x68   : > { %v575_v57 = vld [vmem:[#allocation5 + $0x2c8] sm:$0xff]  ;;  %v524_v23 = vld [vmem:[#allocation5 + $0x130] sm:$0xff] }
  0x69   : > { %v579_v63 = vld [vmem:[#allocation5 + $0x2e8] sm:$0xff] }
  0xe5   : > { %v237_v11 = vpop.xlane.xlu0 %236  ;;  %v246_v13 = vpop.xlane.xlu1 %245 }
  0xe6   : > { %v242_v14 = vmul.f32 0.00390625, %v237_v11  ;;  %v1002_v11 = vpack.c.bf16 %v516_v9, %v514_v8  ;;  %v580_v8 = vld [vmem:[#allocation5 + $0x2f0] sm:$0xff]  ;;  %v583_v9 = vld [vmem:[#allocation5 + $0x308] sm:$0xff] }
  0xe8   : > { %v253_v18 = vsel %vm252_vm1, %v242_v14, %v246_v13  ;;  %v521_v13 = vld [vmem:[#allocation5 + $0x118] sm:$0xff] }
  0xe9   : > { %v240_v15 = vpop.xlane.xlu0 %239  ;;  %v249_v16 = vpop.xlane.xlu1 %248  ;;  %v1004_v14 = vpack.c.bf16 %v521_v13, %v519_v12 }
  0xea   : > { %v243_v17 = vmul.f32 0.00390625, %v240_v15  ;;  %v518_v15 = vld [vmem:[#allocation5 + $0x100] sm:$0xff] }
  0xec   : > { %v254_v19 = vsel %vm252_vm1, %v243_v17, %v249_v16  ;;  %v520_v16 = vld [vmem:[#allocation5 + $0x110] sm:$0xff] }
  0xed   : > { %v970_v20 = vpack.c.bf16 %v254_v19, %v253_v18  ;;  %v1006_v17 = vpack.c.bf16 %v520_v16, %v518_v15  ;;  %v551_v18 = vld [vmem:[#allocation5 + $0x208] sm:$0xff]  ;;  %v553_v19 = vld [vmem:[#allocation5 + $0x218] sm:$0xff]  ;;  %v584_v15 = vld [vmem:[#allocation5 + $0x310] sm:$0xff] }
  0xee   : > { %v1036_v27 = vpack.c.bf16 %v553_v19, %v551_v18  ;;  %v525_v18 = vld [vmem:[#allocation5 + $0x138] sm:$0xff]  ;;  %v587_v19 = vld [vmem:[#allocation5 + $0x328] sm:$0xff] }
  0xef   : > { %971 = vmatpush3.bf16.msra.mxu0 %v970_v20  ;;  %v550_v20 = vld [vmem:[#allocation5 + $0x200] sm:$0xff] }
  0xf0   : > { %973 = vmatprep.subr.bf16.mxu0 %v972_v25 }
  0xf2   : > { %962 = vmatmul.mubr.msk.f32.vlgmr.msra.gmra.mrb[0].mxu0 %vm256_vm2, %v255_v21  ;;  %v552_v21 = vld [vmem:[#allocation5 + $0x210] sm:$0xff] }
  0xf3   : > { %975 = vmatpush1.bf16.msra.mxu0 %v974_v28  ;;  %v332_v28 = vld [vmem:[%s1627_s2 + $0x8] sm:$0xff]  ;;  %v1038_v29 = vpack.c.bf16 %v552_v21, %v550_v20  ;;  %v589_v21 = vld [vmem:[#allocation5 + $0x338] sm:$0xff] }
  0xf4   : > { %977 = vmatprep.subr.bf16.mxu0 %v976_v31  ;;  %v554_v31 = vld [vmem:[#allocation5 + $0x220] sm:$0xff]  ;;  %v1072_v24 = vpack.c.bf16 %v589_v21, %v587_v19  ;;  %v603_v19 = vld [vmem:[#allocation5 + $0x3a8] sm:$0xff] }
  0xf5   : > { %v1042_v35 = vpack.c.bf16 %v556_v32, %v554_v31  ;;  %v591_v31 = vld [vmem:[#allocation5 + $0x348] sm:$0xff]  ;;  %v462_v32 = vadd.f32 %v1538_v5, %v1530_v1 }
  0xf7   : > { %979 = vmatpush1.bf16.msra.mxu0 %v978_v34  ;;  %v561_v34 = vld [vmem:[#allocation5 + $0x258] sm:$0xff] }
  0xf8   : > { %981 = vmatprep.subr.bf16.mxu0 %v980_v37  ;;  %v1044_v36 = vpack.c.bf16 %v561_v34, %v559_v33  ;;  %v558_v37 = vld [vmem:[#allocation5 + $0x240] sm:$0xff]  ;;  %v479_v33 = vmax.f32 %v1530_v1, %v1538_v5  ;;  %v455_v34 = vadd.f32 %v1532_v2, %v1528_v0 }
  0xf9   : > { %v1046_v41 = vpack.c.bf16 %v560_v38, %v558_v37  ;;  %v526_v37 = vld [vmem:[#allocation5 + $0x140] sm:$0xff]  ;;  %v528_v38 = vld [vmem:[#allocation5 + $0x150] sm:$0xff] }
  0xfb   : > { %983 = vmatpush1.bf16.msra.mxu0 %v982_v40  ;;  %v565_v40 = vld [vmem:[#allocation5 + $0x278] sm:$0xff] }
  0xfc   : > { %985 = vmatprep.subr.bf16.mxu0 %v984_v43  ;;  %v1048_v42 = vpack.c.bf16 %v565_v40, %v563_v39  ;;  %v562_v43 = vld [vmem:[#allocation5 + $0x260] sm:$0xff]  ;;  %v472_v39 = vmax.f32 %v1528_v0, %v1532_v2 }
  0xfd   : > { %v1050_v47 = vpack.c.bf16 %v564_v44, %v562_v43  ;;  %v592_v43 = vld [vmem:[#allocation5 + $0x350] sm:$0xff]  ;;  %v531_v44 = vld [vmem:[#allocation5 + $0x168] sm:$0xff] }
  0xff   : > { %987 = vmatpush1.bf16.msra.mxu0 %v986_v46  ;;  %v569_v46 = vld [vmem:[#allocation5 + $0x298] sm:$0xff] }
 0x100   : > { %989 = vmatprep.subr.bf16.mxu0 %v988_v49  ;;  %v1052_v48 = vpack.c.bf16 %v569_v46, %v567_v45  ;;  %v566_v49 = vld [vmem:[#allocation5 + $0x280] sm:$0xff]  ;;  %v463_v45 = vrot.slane %v462_v32, 4  ;;  %v480_v46 = vrot.slane %v479_v33, 4 }
 0x101   : > { %v1054_v53 = vpack.c.bf16 %v568_v50, %v566_v49  ;;  %v595_v49 = vld [vmem:[#allocation5 + $0x368] sm:$0xff]  ;;  %v597_v50 = vld [vmem:[#allocation5 + $0x378] sm:$0xff] }
 0x103   : > { %991 = vmatpush1.bf16.msra.mxu0 %v990_v52  ;;  %v573_v52 = vld [vmem:[#allocation5 + $0x2b8] sm:$0xff] }
 0x104   : > { %993 = vmatprep.subr.bf16.mxu0 %v992_v55  ;;  %v1056_v54 = vpack.c.bf16 %v573_v52, %v571_v51  ;;  %v570_v55 = vld [vmem:[#allocation5 + $0x2a0] sm:$0xff]  ;;  %v456_v51 = vrot.slane %v455_v34, 4 }
 0x105   : > { %v1058_v59 = vpack.c.bf16 %v572_v56, %v570_v55  ;;  %v532_v55 = vld [vmem:[#allocation5 + $0x170] sm:$0xff]  ;;  %v594_v56 = vld [vmem:[#allocation5 + $0x360] sm:$0xff] }
 0x107   : > { %995 = vmatpush1.bf16.msra.mxu0 %v994_v58  ;;  %v577_v58 = vld [vmem:[#allocation5 + $0x2d8] sm:$0xff] }
 0x108   : > { %997 = vmatprep.subr.bf16.mxu0 %v996_v61  ;;  %v1060_v60 = vpack.c.bf16 %v577_v58, %v575_v57  ;;  %v574_v61 = vld [vmem:[#allocation5 + $0x2c0] sm:$0xff]  ;;  %v464_v57 = vadd.f32 %v463_v45, %v462_v32  ;;  %v481_v58 = vmax.f32 %v479_v33, %v480_v46 }
 0x109   : > { %v1062_v4 = vpack.c.bf16 %v576_v62, %v574_v61  ;;  %v535_v61 = vld [vmem:[#allocation5 + $0x188] sm:$0xff]  ;;  %v537_v62 = vld [vmem:[#allocation5 + $0x198] sm:$0xff]  ;;  %v542_v46 = vld [vmem:[#allocation5 + $0x1c0] sm:$0xff] }
 0x10b   : > { %999 = vmatpush1.bf16.msra.mxu0 %v998_v3  ;;  %v581_v3 = vld [vmem:[#allocation5 + $0x2f8] sm:$0xff] }
 0x10c   : > { %1001 = vmatprep.subr.bf16.mxu0 %v1000_v7  ;;  %v1064_v6 = vpack.c.bf16 %v581_v3, %v579_v63  ;;  %v578_v7 = vld [vmem:[#allocation5 + $0x2e0] sm:$0xff]  ;;  %v457_v63 = vadd.f32 %v456_v51, %v455_v34  ;;  %v473_v3 = vrot.slane %v472_v39, 4  ;;  %v604_v34 = vld [vmem:[#allocation5 + $0x3b0] sm:$0xff] }
 0x10d   : > { %v1066_v12 = vpack.c.bf16 %v580_v8, %v578_v7  ;;  %v599_v7 = vld [vmem:[#allocation5 + $0x388] sm:$0xff]  ;;  %v601_v8 = vld [vmem:[#allocation5 + $0x398] sm:$0xff]  ;;  %v608_v51 = vld [vmem:[#allocation5 + $0x3d0] sm:$0xff] }
 0x10f   : > { %1003 = vmatpush1.bf16.msra.mxu0 %v1002_v11  ;;  %v585_v11 = vld [vmem:[#allocation5 + $0x318] sm:$0xff] }
 0x110   : > { %1005 = vmatprep.subr.bf16.mxu0 %v1004_v14  ;;  %v1068_v13 = vpack.c.bf16 %v585_v11, %v583_v9  ;;  %v582_v14 = vld [vmem:[#allocation5 + $0x300] sm:$0xff]  ;;  %v465_v11 = vrot.slane %v464_v57, 2 }
 0x111   : > { %v1070_v16 = vpack.c.bf16 %v584_v15, %v582_v14  ;;  %v534_v9 = vld [vmem:[#allocation5 + $0x180] sm:$0xff]  ;;  %v536_v14 = vld [vmem:[#allocation5 + $0x190] sm:$0xff] }
 0x112   : > { %v598_v15 = vld [vmem:[#allocation5 + $0x380] sm:$0xff] }
 0x113   : > { %1007 = vmatpush1.bf16.msra.mxu0 %v1006_v17  ;;  %v523_v17 = vld [vmem:[#allocation5 + $0x128] sm:$0xff] }
 0x114   : > { %v1008_v20 = vpack.c.bf16 %v525_v18, %v523_v17  ;;  %v539_v17 = vld [vmem:[#allocation5 + $0x1a8] sm:$0xff]  ;;  %v541_v18 = vld [vmem:[#allocation5 + $0x1b8] sm:$0xff] }
 0x116   : > { %1009 = vmatprep.subr.bf16.mxu0 %v1008_v20  ;;  %v466_v20 = vadd.f32 %v465_v11, %v464_v57 }
 0x1c5   : > { %v326_v22 = vpop.f32.mrb[0].mxu0 }
 0x1c6   : > { %v330_v25 = vmax.f32 %v326_v22, 0.0  ;;  %v963_v26 = vpop.f32.mrb[1].mxu0  ;;  %v522_v22 = vld [vmem:[#allocation5 + $0x120] sm:$0xff] }
 0x1c7   : > { %v586_v26 = vld [vmem:[#allocation5 + $0x320] sm:$0xff] }
 0x1c8   : > { %964 = vmatprep.subr.msk.mxu1 %vm340_vm4, %v330_v25 }
 0x1c9   : > { %965 = vmatpush3.msk.msra.mxu1 %vm340_vm4, %v330_v25  ;;  %v1010_v25 = vpack.c.bf16 %v524_v23, %v522_v22  ;;  %v458_v22 = vrot.slane %v457_v63, 2  ;;  %v1022_v23 = vpack.c.bf16 %v536_v14, %v534_v9 }
 0x1ca   : > { %967 = vmatmul.mubr.msk.f32.vlgmr.msra.gmra.mrb[0].mxu1 %vm333_vm3, %v332_v28  ;;  %1037 = vmatprep.subr.bf16.mxu1 %v1036_v27  ;;  %v588_v27 = vld [vmem:[#allocation5 + $0x330] sm:$0xff] }
 0x1cb   : > { %1039 = vmatpush1.bf16.msra.mxu1 %v1038_v29  ;;  %v1074_v28 = vpack.c.bf16 %v588_v27, %v586_v26  ;;  %v527_v29 = vld [vmem:[#allocation5 + $0x148] sm:$0xff]  ;;  %1011 = vmatpush1.bf16.msra.mxu0 %v1010_v25  ;;  %v474_v25 = vmax.f32 %v472_v39, %v473_v3  ;;  %v1024_v27 = vpack.c.bf16 %v541_v18, %v539_v17  ;;  %v610_v3 = vld [vmem:[#allocation5 + $0x3e0] sm:$0xff] }
 0x1cc   : > { %1041 = vmatprep.subr.bf16.mxu1 %v1040_v30  ;;  %v529_v30 = vld [vmem:[#allocation5 + $0x158] sm:$0xff] }
 0x1cf   : > { %1043 = vmatpush1.bf16.msra.mxu1 %v1042_v35  ;;  %v1012_v35 = vpack.c.bf16 %v529_v30, %v527_v29  ;;  %v540_v29 = vld [vmem:[#allocation5 + $0x1b0] sm:$0xff]  ;;  %v602_v30 = vld [vmem:[#allocation5 + $0x3a0] sm:$0xff] }
 0x1d0   : > { %1045 = vmatprep.subr.bf16.mxu1 %v1044_v36  ;;  %v593_v36 = vld [vmem:[#allocation5 + $0x358] sm:$0xff] }
 0x1d1   : > { %v1076_v40 = vpack.c.bf16 %v593_v36, %v591_v31  ;;  %1013 = vmatprep.subr.bf16.mxu0 %v1012_v35  ;;  %v467_v31 = vrot.slane %v466_v20, 1  ;;  %v543_v35 = vld [vmem:[#allocation5 + $0x1c8] sm:$0xff]  ;;  %v545_v36 = vld [vmem:[#allocation5 + $0x1d8] sm:$0xff] }
 0x1d2   : > { %v1028_v45 = vpack.c.bf16 %v545_v36, %v543_v35 }
 0x1d3   : > { %1047 = vmatpush1.bf16.msra.mxu1 %v1046_v41  ;;  %v1014_v41 = vpack.c.bf16 %v528_v38, %v526_v37  ;;  %v607_v37 = vld [vmem:[#allocation5 + $0x3c8] sm:$0xff]  ;;  %v609_v38 = vld [vmem:[#allocation5 + $0x3d8] sm:$0xff] }
 0x1d4   : > { %1049 = vmatprep.subr.bf16.mxu1 %v1048_v42  ;;  %v590_v42 = vld [vmem:[#allocation5 + $0x340] sm:$0xff] }
 0x1d5   : > { %1015 = vmatpush1.bf16.msra.mxu0 %v1014_v41 }
 0x1d7   : > { %1051 = vmatpush1.bf16.msra.mxu1 %v1050_v47  ;;  %v1078_v47 = vpack.c.bf16 %v592_v43, %v590_v42  ;;  %v459_v42 = vadd.f32 %v458_v22, %v457_v63  ;;  %v475_v43 = vrot.slane %v474_v25, 2 }
 0x1d8   : > { %1053 = vmatprep.subr.bf16.mxu1 %v1052_v48  ;;  %v533_v48 = vld [vmem:[#allocation5 + $0x178] sm:$0xff] }
 0x1d9   : > { %v1016_v52 = vpack.c.bf16 %v533_v48, %v531_v44  ;;  %v1090_v44 = vpack.c.bf16 %v604_v34, %v602_v30  ;;  %v606_v48 = vld [vmem:[#allocation5 + $0x3c0] sm:$0xff] }
 0x1db   : > { %1055 = vmatpush1.bf16.msra.mxu1 %v1054_v53  ;;  %v1080_v53 = vpack.c.bf16 %v597_v50, %v595_v49  ;;  %1017 = vmatprep.subr.bf16.mxu0 %v1016_v52  ;;  %v1092_v50 = vpack.c.bf16 %v609_v38, %v607_v37  ;;  %v547_v52 = vld [vmem:[#allocation5 + $0x1e8] sm:$0xff]  ;;  %v769_v38 = vshrl.u32 %v250_v10, 7 }
 0x1dc   : > { %1057 = vmatprep.subr.bf16.mxu1 %v1056_v54  ;;  %v530_v54 = vld [vmem:[#allocation5 + $0x160] sm:$0xff] }
 0x1df   : > { %1059 = vmatpush1.bf16.msra.mxu1 %v1058_v59  ;;  %v1018_v59 = vpack.c.bf16 %v532_v55, %v530_v54  ;;  %v611_v54 = vld [vmem:[#allocation5 + $0x3e8] sm:$0xff]  ;;  %v613_v55 = vld [vmem:[#allocation5 + $0x3f8] sm:$0xff] }
 0x1e0   : > { %1061 = vmatprep.subr.bf16.mxu1 %v1060_v60  ;;  %v596_v60 = vld [vmem:[#allocation5 + $0x370] sm:$0xff]  ;;  %v1096_v63 = vpack.c.bf16 %v613_v55, %v611_v54 }
 0x1e1   : > { %1019 = vmatpush1.bf16.msra.mxu0 %v1018_v59  ;;  %v1094_v59 = vpack.c.bf16 %v608_v51, %v606_v48 }
 0x1e3   : > { %1063 = vmatpush1.bf16.msra.mxu1 %v1062_v4  ;;  %v1082_v4 = vpack.c.bf16 %v596_v60, %v594_v56  ;;  %v460_v56 = vrot.slane %v459_v42, 1 }
 0x1e4   : > { %1065 = vmatprep.subr.bf16.mxu1 %v1064_v6  ;;  %v1020_v6 = vpack.c.bf16 %v537_v62, %v535_v61  ;;  %v546_v61 = vld [vmem:[#allocation5 + $0x1e0] sm:$0xff]  ;;  %v548_v62 = vld [vmem:[#allocation5 + $0x1f0] sm:$0xff] }
 0x1e6   : > { %1021 = vmatprep.subr.bf16.mxu0 %v1020_v6  ;;  %v461_v6 = vadd.f32 %v460_v56, %v459_v42 }
 0x1e7   : > { %1067 = vmatpush1.bf16.msra.mxu1 %v1066_v12  ;;  %v482_v12 = vrot.slane %v481_v58, 2  ;;  %1023 = vmatpush1.bf16.msra.mxu0 %v1022_v23 }
 0x1e8   : > { %1069 = vmatprep.subr.bf16.mxu1 %v1068_v13  ;;  %v1084_v13 = vpack.c.bf16 %v601_v8, %v599_v7  ;;  %1025 = vmatprep.subr.bf16.mxu0 %v1024_v27  ;;  %v1034_v7 = vpack.c.bf16 %v548_v62, %v546_v61  ;;  %v470_v11 = vmul.f32 0.0625, %v461_v6 }
 0x1e9   : > { %v483_v21 = vmax.f32 %v481_v58, %v482_v12  ;;  %v476_v58 = vmax.f32 %v474_v25, %v475_v43 }
 0x1eb   : > { %1071 = vmatpush1.bf16.msra.mxu1 %v1070_v16  ;;  %v600_v16 = vld [vmem:[#allocation5 + $0x390] sm:$0xff]  ;;  %v484_v32 = vrot.slane %v483_v21, 1  ;;  %v477_v8 = vrot.slane %v476_v58, 1 }
 0x1ec   : > { %1073 = vmatprep.subr.bf16.mxu1 %v1072_v24  ;;  %v605_v24 = vld [vmem:[#allocation5 + $0x3b8] sm:$0xff]  ;;  %v1086_v26 = vpack.c.bf16 %v600_v16, %v598_v15  ;;  %v1340_v15 = vmov 0  }
 0x1ed   : > { %v1088_v33 = vpack.c.bf16 %v605_v24, %v603_v19  ;;  %v485_v41 = vmax.f32 %v483_v21, %v484_v32  ;;  %v478_v12 = vmax.f32 %v476_v58, %v477_v8  ;;  %1168 = vset.pattern.permute.xlu1 %v1340_v15  ;;  %1169 = vset.pattern.permute.xlu0 %v1340_v15 }
 0x1ef   : > { %1075 = vmatpush1.bf16.msra.mxu1 %v1074_v28  ;;  %v538_v28 = vld [vmem:[#allocation5 + $0x1a0] sm:$0xff]  ;;  %749 = vmatprep.mubr.f32.mxu1 %v485_v41 }
 0x1f0   : > { %1077 = vmatprep.subr.bf16.mxu1 %v1076_v40  ;;  %v468_v40 = vadd.f32 %v467_v31, %v466_v20  ;;  %v1026_v39 = vpack.c.bf16 %v540_v29, %v538_v28 }
 0x1f2   : > { %v471_v49 = vmul.f32 0.0625, %v468_v40  ;;  %1027 = vmatpush1.bf16.msra.mxu0 %v1026_v39  ;;  %v770_v40 = vsub.s32 0, %v769_v38 }
 0x1f3   : > { %1079 = vmatpush1.bf16.msra.mxu1 %v1078_v47  ;;  %v544_v47 = vld [vmem:[#allocation5 + $0x1d0] sm:$0xff]  ;;  %1029 = vmatprep.subr.bf16.mxu0 %v1028_v45 }
 0x1f4   : > { %1081 = vmatprep.subr.bf16.mxu1 %v1080_v53  ;;  %v549_v53 = vld [vmem:[#allocation5 + $0x1f8] sm:$0xff]  ;;  %678 = vmatprep.mubr.f32.mxu0 %v471_v49  ;;  %v1030_v57 = vpack.c.bf16 %v544_v47, %v542_v46 }
 0x1f5   : > { %v1032_v60 = vpack.c.bf16 %v549_v53, %v547_v52 }
 0x1f6   : > { %1031 = vmatpush1.bf16.msra.mxu0 %v1030_v57 }
 0x1f7   : > { %1083 = vmatpush1.bf16.msra.mxu1 %v1082_v4  ;;  %v612_v4 = vld [vmem:[#allocation5 + $0x3f0] sm:$0xff]  ;;  %1033 = vmatprep.subr.bf16.mxu0 %v1032_v60 }
 0x1f8   : > { %1085 = vmatprep.subr.bf16.mxu1 %v1084_v13  ;;  %v1098_v9 = vpack.c.bf16 %v612_v4, %v610_v3 }
 0x1fa   : > { %1035 = vmatpush1.bf16.msra.mxu0 %v1034_v7 }
 0x1fb   : > { %1087 = vmatpush1.bf16.msra.mxu1 %v1086_v26 }
 0x1fc   : > { %1089 = vmatprep.subr.bf16.mxu1 %v1088_v33 }
 0x1fd   : > { %679 = vmatmul.mubr.f32.vlgmr.msra.gmra.mrb[2].mxu0 %v470_v11 }
 0x1ff   : > { %1091 = vmatpush1.bf16.msra.mxu1 %v1090_v44 }
 0x200   : > { %1093 = vmatprep.subr.bf16.mxu1 %v1092_v50 }
 0x203   : > { %1095 = vmatpush1.bf16.msra.mxu1 %v1094_v59 }
 0x204   : > { %1097 = vmatprep.subr.bf16.mxu1 %v1096_v63 }
 0x207   : > { %1099 = vmatpush1.bf16.msra.mxu1 %v1098_v9 }
 0x20a   : > { %750 = vmatmul.mubr.f32.vlgmr.msra.gmra.mrb[2].mxu1 %v478_v12 }
 0x29d   : > { %v968_v13 = vpop.f32.mrb[0].mxu1 }
 0x29e   : > { %423 = vrot.lane.b32.xlu1 %v968_v13, %s1339_s10  ;;  %v410_v14 = vpop.f32.mrb[1].mxu1 }
 0x29f   : > { %421 = vrot.lane.b32.xlu0 %v410_v14, %s1339_s10 }
 0x2d0   : > { %v680_v16 = vpop.f32.mrb[2].mxu0 }
 0x2d1   : > { %v682_v18 = vpop.f32.mrb[3].mxu0 }
 0x2dd   : > { %v751_v17 = vpop.f32.mrb[2].mxu1 }
 0x2de   : > { %v752_v20 = vadd.f32 %v751_v17, %v680_v16  ;;  %v753_v21 = vpop.f32.mrb[3].mxu1 }
 0x2df   : > { %v754_v24 = vadd.f32 %v753_v21, %v682_v18 }
 0x2e0   : > { %v938_v26 = vmul.f32 -1.442695, %v752_v20 }
 0x2e1   : > { %v939_v28 = vmul.f32 -1.442695, %v754_v24 }
 0x2e2   : > { %1170 = vpow2.f32 %v938_v26 }
 0x2ec   : > { %v1171_v30 = vpop.eup %1170 }
 0x2ed   : > { %v762_v32 = vadd.f32 1.0, %v1171_v30 }
 0x310   : > { %v424_v19 = vpop.permute.xlu1 %423 }
 0x311   : > { %v428_v22 = vadd.f32 %v968_v13, %v424_v19  ;;  %v422_v23 = vpop.permute.xlu0 %421 }
 0x312   : > { %v427_v25 = vadd.f32 %v422_v23, %v410_v14 }
 0x313   : > { %v937_v27 = vmul.f32 -1.442695, %v428_v22 }
 0x314   : > { %v936_v29 = vmul.f32 -1.442695, %v427_v25 }
 0x315   : > { %1172 = vpow2.f32 %v937_v27 }
 0x316   : > { %1174 = vpow2.f32 %v936_v29 }
 0x317   : > { %1176 = vpow2.f32 %v939_v28 }
 0x318   : > { %1178 = vrcp.f32 %v762_v32 }
 0x31f   : > { %v1173_v31 = vpop.eup %1172 }
 0x320   : > { %v1175_v33 = vpop.eup %1174  ;;  %v436_v37 = vadd.f32 1.0, %v1173_v31 }
 0x321   : > { %v1177_v34 = vpop.eup %1176  ;;  %v435_v35 = vadd.f32 1.0, %v1175_v33 }
 0x322   : > { %v763_v36 = vadd.f32 1.0, %v1177_v34  ;;  %v1179_v41 = vpop.eup %1178 }
 0x323   : > { %1180 = vrcp.f32 %v435_v35  ;;  %v771_v42 = vrot.slane %v1179_v41, %v770_v40 }
 0x324   : > { %1182 = vrcp.f32 %v763_v36 }
 0x325   : > { %1184 = vrcp.f32 %v436_v37  ;;  %v776_v46 = vmul.f32 %v771_v42, %v1528_v0  ;;  %v778_v52 = vmul.f32 %v771_v42, %v1532_v2 }
 0x32d   : > { %v1181_v39 = vpop.eup %1180 }
 0x32e   : > { %v1183_v43 = vpop.eup %1182  ;;  %443 = vperm.xlu1 %1168, %v1181_v39  }
 0x32f   : > { %v775_v44 = vrot.slane %v1183_v43, %v770_v40  ;;  %v1185_v45 = vpop.eup %1184 }
 0x331   : > { %v777_v47 = vmul.f32 %v775_v44, %v1530_v1  ;;  %v779_v53 = vmul.f32 %v775_v44, %v1538_v5 }
 0x332   : > { %448 = vperm.xlu1 %1168, %v1185_v45  }
 0x3ad   : > { %v444_v48 = vpop.permute.xlu1 %443 }
 0x3ae   : > { %v451_v49 = vmul.f32 %v444_v48, %v1528_v0  ;;  %v452_v10 = vmul.f32 %v444_v48, %v1530_v1 }
 0x3b0   : > { %v780_v50 = vadd.f32 %v776_v46, %v451_v49  ;;  %v781_v51 = vadd.f32 %v777_v47, %v452_v10  ;;  %v808_v7 = vsub.f32 %v451_v49, %v776_v46  ;;  %v809_v9 = vsub.f32 %v452_v10, %v777_v47 }
 0x3b1   : > { %v449_v54 = vpop.permute.xlu1 %448 }
 0x3b2   : > { %v940_v55 = vmul.f32 -1.442695, %v780_v50  ;;  %v941_v56 = vmul.f32 -1.442695, %v781_v51  ;;  %v453_v57 = vmul.f32 %v449_v54, %v1532_v2  ;;  %v454_v58 = vmul.f32 %v449_v54, %v1538_v5 }
 0x3b4   : > { %1186 = vpow2.f32 %v940_v55  ;;  %v782_v59 = vadd.f32 %v778_v52, %v453_v57  ;;  %v783_v60 = vadd.f32 %v779_v53, %v454_v58  ;;  %v810_v15 = vsub.f32 %v453_v57, %v778_v52 }
 0x3b5   : > { %1188 = vpow2.f32 %v941_v56  ;;  %v811_v18 = vsub.f32 %v454_v58, %v779_v53 }
 0x3b6   : > { %v942_v0 = vmul.f32 -1.442695, %v782_v59  ;;  %v943_v61 = vmul.f32 -1.442695, %v783_v60 }
 0x3b8   : > { %1190 = vpow2.f32 %v942_v0 }
 0x3b9   : > { %1192 = vpow2.f32 %v943_v61 }
 0x3be   : > { %v1187_v1 = vpop.eup %1186 }
 0x3bf   : > { %v1189_v62 = vpop.eup %1188  ;;  %v796_v63 = vadd.f32 1.0, %v1187_v1 }
 0x3c0   : > { %v797_v3 = vadd.f32 1.0, %v1189_v62 }
 0x3c1   : > { %1194 = vrcp.f32 %v796_v63 }
 0x3c2   : > { %v1191_v4 = vpop.eup %1190  ;;  %1196 = vrcp.f32 %v797_v3 }
 0x3c3   : > { %v1193_v6 = vpop.eup %1192  ;;  %v798_v2 = vadd.f32 1.0, %v1191_v4 }
 0x3c4   : > { %v799_v5 = vadd.f32 1.0, %v1193_v6 }
 0x3c5   : > { %1198 = vrcp.f32 %v798_v2 }
 0x3c6   : > { %1200 = vrcp.f32 %v799_v5 }
 0x3cb   : > { %v1195_v8 = vpop.eup %1194 }
 0x3cc   : > { %v1197_v11 = vpop.eup %1196  ;;  %v812_v12 = vmul.f32 %v1195_v8, %v808_v7 }
 0x3cd   : > { %v813_v13 = vmul.f32 %v1197_v11, %v809_v9 }
 0x3ce   : > { %v816_v14 = vadd.f32 %v812_v12, %v776_v46 }
 0x3cf   : > { %v1199_v16 = vpop.eup %1198  ;;  %v817_v17 = vadd.f32 %v813_v13, %v777_v47 }
 0x3d0   : > { %v1201_v19 = vpop.eup %1200  ;;  %820 = vst [vmem:[%s230_s7] sm:$0xff] %v816_v14  ;;  %v814_v20 = vmul.f32 %v1199_v16, %v810_v15 }
 0x3d1   : > { %821 = vst [vmem:[%s230_s7 + $0x8] sm:$0xff] %v817_v17  ;;  %v815_v21 = vmul.f32 %v1201_v19, %v811_v18 }
 0x3d2   : > { %v818_v22 = vadd.f32 %v814_v20, %v778_v52 }
 0x3d3   : > { %v819_v23 = vadd.f32 %v815_v21, %v779_v53 }
 0x3d4   : > { %822 = vst [vmem:[%s230_s7 + $0x10] sm:$0xff] %v818_v22 }
 0x3d5   : > { %823 = vst [vmem:[%s230_s7 + $0x18] sm:$0xff] %v819_v23 }
 0x3d6   : > { %1273 = shalt.err (!%p1270_p7)
}
 0x3d7   : > { %s1274_s23 = scalar_lea.hbm %s1579_s14, 512  ;;  %s1278_s9 = scalar_lea.hbm %s1629_s4, 1024 }
 0x3d8   : > { %p1275_p9 = scmp.ne.s32.totalorder %s1579_s14, %s1274_s23  ;;  %p1279_p5 = scmp.lt.u32.totalorder %s1579_s14, %s1629_s4 }
 0x3d9   : > { %p1280_p11 = scmp.lt.u32.totalorder %s1278_s9, %s1274_s23  ;;  %p1282_p4 = scmp.lt.u32.totalorder %s1274_s23, %s1579_s14 }
 0x3da   : > { %p1276_p1 = pnand %p1275_p9, %p1463_p12 }
 0x3db   : > { %p1281_p2 = por %p1280_p11, %p1279_p5 }
 0x3dc   : > { %p1277_p0 = pneg %p1276_p1 }
 0x3dd   : > { %p1283_p6 = por %p1282_p4, %p1281_p2 }
 0x3df   : > { %p1284_p8 = pnand %p1283_p6, %p1277_p0 }
 0x3e1   : > { %1287 = shalt.err (!%p1284_p8)
}
 0x3e2   : > { %s1342_s6 = smov 256   ;;  %s1343_s7 = smov 16  }
 0x3e3   : > { %1108 = dma.vmem_to_hbm [thread:$0]  (%p1463_p12), %s1581_s26, 512, %s1579_s14, %s825_s19, %s1342_s6, %s1342_s6, %s1343_s7  }
 0x3e4 PF: > { %s853_s8 = sand.u32 1, %s1318_s15   ;;  %p1644_p10 = scmp.ne.s32.totalorder %s1634_s22, 0 }
 0x3e5   : > { %p1645_p13 = scmp.ge.s32.totalorder %s1330_s18, 2  ;;  %s854_s25 = scalar_lea.sflag [#allocation4], %s853_s8 }
 0x3e7   : > { %p1119_p3 = pnand %p1645_p13, %p1644_p10 }
 0x3e9   : > { %1313 = dma.done.wait (!%p1119_p3), %s854_s25, 512  }
 0x3ea   : > { %1315 = vsyncadd (!%p1119_p3), %s854_s25, 4294966784  ;;  %p18_p7 = scmp.ge.s32.totalorder %s1425_s27, 4   ;;  %s1646_s15 = smov %s1322_s16 }
 0x3eb   : > { %s1647_s16 = smov %s1326_s17  ;;  %s1648_s17 = smov %s1459_s24 }
 0x3ec   : > { %s1649_s18 = smov %s1425_s27  ;;  %20 = sbr.rel (!%p18_p7) target bundleno = 6 (0x6), region = 85 }
 0x3f3   :  { %859 = vsyncpa [#allocation3], 1 }
 0x3f4   :  { %861 = vsyncpa [#allocation3 + $0x1], 1 }
 0x3f5   :  { %862 = vsyncpa [#allocation6], 1 }
 0x3f6   :  { %863 = vsyncpa [#allocation4], 1 }
 0x3f7   :  { %865 = vsyncpa [#allocation4 + $0x1], 1 }

</bundles_post_ra>
